<compile_context>
chip_gen: v6e
topology: v6e:2x2x1
jax: 0.10.0
libtpu: 0.0.40
codegen_flags: <defaults>
</compile_context>

<pallas_src>
import functools

import jax
import jax.numpy as jnp
from jax.experimental import pallas as pl
from jax.experimental.pallas import tpu as pltpu

EPS = 1e-5  # nn.InstanceNorm2d default eps
_MIB = 1024 * 1024


# --------------------------------------------------------------------------- #
# Shared math: per-(n, c) spatial sums -> per-(n, c) output coefficients       #
# --------------------------------------------------------------------------- #
def _derive_coefs(l_nc, xl_nc, x_nc, x2l_nc, x2_nc, hw):
    """From per-(n,c) spatial sums of {lab, x*lab, x, x^2*lab, x^2} derive the
    per-(n,c) coefficients of  out = x * scale + shift  (fg / bg variants).

    Batch must be axis 0; works on (N, CB, 1) arrays inside the kernel and on
    (N, C) arrays in the two-pass host glue.
    """
    n_batch = l_nc.shape[0]
    hw_f = jnp.float32(hw)
    total = jnp.float32(n_batch) * hw_f                     # N * H * W

    # per-channel region statistics (sum over batch as well)
    sr_fg = jnp.sum(l_nc, axis=0, keepdims=True)
    sr_bg = total - sr_fg
    sr_fg = jnp.where(sr_fg == 0.0, 1.0, sr_fg)             # PyTorch: Sr[Sr == 0] = 1
    sr_bg = jnp.where(sr_bg == 0.0, 1.0, sr_bg)
    sum_x = jnp.sum(x_nc, axis=0, keepdims=True)
    sum_fg = jnp.sum(xl_nc, axis=0, keepdims=True)
    mu_fg = sum_fg / sr_fg                                  # per-channel fill value
    mu_bg = (sum_x - sum_fg) / sr_bg

    def region(l, xl, x2l, mu, sr):
        # filled = x on the region, mu elsewhere (binary mask):
        #   sum(filled)          = xl + (HW - l) * mu
        #   sum((filled - mu)^2) = sum(mask * (x - mu)^2)   (fill positions deviate by 0)
        dm = (xl - l * mu) / hw_f                           # InstanceNorm mean - mu
        m = mu + dm
        ssq = x2l - 2.0 * mu * xl + mu * mu * l             # mu-shifted sum of squares
        var = jnp.maximum(ssq / hw_f - dm * dm, 0.0)        # biased var, clamp roundoff
        g = jax.lax.rsqrt(var + EPS) * jnp.sqrt(sr / total)
        return m, g

    m_fg, g_fg = region(l_nc, xl_nc, x2l_nc, mu_fg, sr_fg)
    m_bg, g_bg = region(hw_f - l_nc, x_nc - xl_nc, x2_nc - x2l_nc, mu_bg, sr_bg)

    # out(fg pixel) = (x - m_fg)*g_fg + (mu_bg - m_bg)*g_bg = x*g_fg + c_fg
    # out(bg pixel) = (mu_fg - m_fg)*g_fg + (x - m_bg)*g_bg = x*g_bg + c_bg
    c_fg = (mu_bg - m_bg) * g_bg - m_fg * g_fg
    c_bg = (mu_fg - m_fg) * g_fg - m_bg * g_bg
    return g_fg, g_bg, c_fg, c_bg


# --------------------------------------------------------------------------- #
# Kernels                                                                      #
# --------------------------------------------------------------------------- #
def _fused_kernel(x_ref, lab_ref, o_ref, *, hw):
    """Single-pass fused kernel.  Blocks: (N, CB, HW), native HBM dtypes."""
    x = x_ref[...].astype(jnp.float32)          # one upcast pass (v5e: f32 VPU only)
    is_fg = lab_ref[...] != 0                   # label is binary
    labf = is_fg.astype(jnp.float32)

    xl = x * labf
    l_nc = jnp.sum(labf, axis=2, keepdims=True)             # (N, CB, 1)
    xl_nc = jnp.sum(xl, axis=2, keepdims=True)
    x_nc = jnp.sum(x, axis=2, keepdims=True)
    x2l_nc = jnp.sum(xl * x, axis=2, keepdims=True)         # x^2*lab == (x*lab)*x
    x2_nc = jnp.sum(x * x, axis=2, keepdims=True)

    g_fg, g_bg, c_fg, c_bg = _derive_coefs(l_nc, xl_nc, x_nc, x2l_nc, x2_nc, hw)

    out = x * jnp.where(is_fg, g_fg, g_bg) + jnp.where(is_fg, c_fg, c_bg)
    o_ref[...] = out.astype(o_ref.dtype)


def _stats_kernel(x_ref, lab_ref, stats_ref, *, hw, hw_block):
    """Two-pass fallback, pass 1: accumulate per-(n,c) sums over HW chunks."""
    j = pl.program_id(1)

    @pl.when(j == 0)
    def _():
        stats_ref[...] = jnp.zeros_like(stats_ref)

    x = x_ref[...].astype(jnp.float32)                      # (N, CB, HB)
    labf = (lab_ref[...] != 0).astype(jnp.float32)

    if hw % hw_block != 0:
        # last spatial chunk runs past HW: mask the tail out of the sums
        lane = jax.lax.broadcasted_iota(jnp.int32, x.shape, 2) + j * hw_block
        valid = lane < hw
        x = jnp.where(valid, x, 0.0)
        labf = jnp.where(valid, labf, 0.0)

    xl = x * labf
    stats_ref[:, :, 0:1] += jnp.sum(labf, axis=2, keepdims=True)
    stats_ref[:, :, 1:2] += jnp.sum(xl, axis=2, keepdims=True)
    stats_ref[:, :, 2:3] += jnp.sum(x, axis=2, keepdims=True)
    stats_ref[:, :, 3:4] += jnp.sum(xl * x, axis=2, keepdims=True)
    stats_ref[:, :, 4:5] += jnp.sum(x * x, axis=2, keepdims=True)


def _apply_kernel(x_ref, lab_ref, coef_ref, o_ref):
    """Two-pass fallback, pass 2: fused elementwise normalization."""
    x = x_ref[...].astype(jnp.float32)
    is_fg = lab_ref[...] != 0
    scale = jnp.where(is_fg, coef_ref[:, :, 0:1], coef_ref[:, :, 1:2])
    shift = jnp.where(is_fg, coef_ref[:, :, 2:3], coef_ref[:, :, 3:4])
    o_ref[...] = (x * scale + shift).astype(o_ref.dtype)


# --------------------------------------------------------------------------- #
# Tiling heuristics (generation aware)                                         #
# --------------------------------------------------------------------------- #
def _vmem_budgets():
    """(vmem_limit_bytes, block_budget_bytes) tuned per TPU generation."""
    cap = 64 * _MIB                       # conservative default (v7x-like)
    try:
        info = pltpu.get_tpu_info()
        cap = int(getattr(info, "vmem_capacity_bytes", cap) or cap)
    except Exception:
        pass
    if cap >= 128 * _MIB:                 # v5e / v6e: 128 MiB physical VMEM
        return 64 * _MIB, 20 * _MIB
    if cap >= 64 * _MIB:                  # v7x: 64 MiB physical VMEM
        return 32 * _MIB, 8 * _MIB
    return max(min(cap // 2, 32 * _MIB), 4 * _MIB), max(cap // 8, 2 * _MIB)


def _sublane_align(itemsizes):
    # partial-C blocks must be a multiple of the sublane packing of the
    # narrowest dtype on the channel axis (8 f32 / 16 bf16 / 32 int8)
    return {4: 8, 2: 16, 1: 32}.get(min(itemsizes), 8)


def _pick_c_block(n, c, hw, itemsizes, budget_bytes, limit_bytes):
    """Channel tile for the fused one-pass kernel, or None -> two-pass path."""
    align = _sublane_align(itemsizes)
    # VMEM per channel of a block: double-buffered x/lab/out pipeline copies
    # plus ~4 block-sized f32 temporaries live inside the kernel body.
    per_chan = n * hw * (2 * sum(itemsizes) + 4 * 4)
    max_cb = budget_bytes // max(per_chan, 1)
    if max_cb >= c:
        max_cb = c
    else:
        max_cb = (max_cb // align) * align
    if max_cb <= 0:
        # Preferred budget can't hold even `align` channels; accept the smallest
        # legal block if it still fits comfortably under the hard VMEM limit,
        # otherwise switch to the two-pass path.
        min_cb = min(c, align)
        if per_chan * min_cb <= (3 * limit_bytes) // 4:
            return min_cb
        return None
    # Prefer >=4 grid steps (else >=2) so the pipeline overlaps DMA with
    # compute and both v7x TensorCores get work; never below the align unit.
    for steps in (4, 2):
        cb = (c // steps // align) * align
        if 0 < cb <= max_cb:
            return cb
    return max_cb


def _pick_two_pass_tiles(n, c, hw, itemsizes, budget_bytes):
    """(c_block, hw_block) for the two-pass fallback."""
    align = _sublane_align(itemsizes)
    cb = min(c, align)
    per_elem = 2 * sum(itemsizes) + 5 * 4       # pipeline buffers + f32 temporaries
    max_hb = budget_bytes // max(n * cb * per_elem, 1)
    if max_hb >= hw:
        return cb, hw
    return cb, max(128, (max_hb // 128) * 128)


# --------------------------------------------------------------------------- #
# pallas_call wrappers                                                         #
# --------------------------------------------------------------------------- #
def _run_fused(x, lab, out_dtype, c_block, hw, itemsizes, vmem_limit):
    n, c, _ = x.shape
    grid = (pl.cdiv(c, c_block),)

    # 3-deep input buffering when blocks are small and there are enough grid
    # steps to benefit (hides output writeback / DMA issue latency).
    blk = n * c_block * hw
    tri_bytes = (3 * blk * (itemsizes[0] + itemsizes[1])
                 + 2 * blk * itemsizes[2] + 4 * blk * 4)
    buffered_cls = getattr(pl, "Buffered", None)
    in_mode = (buffered_cls(3)
               if (buffered_cls is not None and grid[0] >= 3 and tri_bytes <= vmem_limit)
               else None)

    def in_spec():
        if in_mode is not None:
            try:
                return pl.BlockSpec((n, c_block, hw), lambda i: (0, i, 0),
                                    pipeline_mode=in_mode)
            except TypeError:           # BlockSpec without pipeline_mode support
                pass
        return pl.BlockSpec((n, c_block, hw), lambda i: (0, i, 0))

    out_spec = pl.BlockSpec((n, c_block, hw), lambda i: (0, i, 0))

    return pl.pallas_call(
        functools.partial(_fused_kernel, hw=hw),
        out_shape=jax.ShapeDtypeStruct((n, c, hw), out_dtype),
        grid_spec=pltpu.PrefetchScalarGridSpec(
            num_scalar_prefetch=0,
            grid=grid,
            in_specs=[in_spec(), in_spec()],
            out_specs=out_spec,
        ),
        compiler_params=pltpu.CompilerParams(
            dimension_semantics=("parallel",),       # channels are independent
            vmem_limit_bytes=vmem_limit,
        ),
    )(x, lab)


def _run_two_pass(x, lab, out_dtype, hw, itemsizes, vmem_limit, block_budget):
    # TODO(synk): extreme shapes where even an (align-channel, 128-lane) tile per
    # full batch exceeds VMEM would additionally need batch splitting.
    n, c, _ = x.shape
    cb, hb = _pick_two_pass_tiles(n, c, hw, itemsizes, block_budget)
    grid = (pl.cdiv(c, cb), pl.cdiv(hw, hb))

    data_spec = pl.BlockSpec((n, cb, hb), lambda i, j: (0, i, j))
    stat_spec = pl.BlockSpec((n, cb, 8), lambda i, j: (0, i, 0))

    # Pass 1: per-(n,c) sums, accumulated over HW chunks (resident output block).
    stats = pl.pallas_call(
        functools.partial(_stats_kernel, hw=hw, hw_block=hb),
        out_shape=jax.ShapeDtypeStruct((n, c, 8), jnp.float32),
        grid_spec=pltpu.PrefetchScalarGridSpec(
            num_scalar_prefetch=0,
            grid=grid,
            in_specs=[data_spec, data_spec],
            out_specs=stat_spec,
        ),
        compiler_params=pltpu.CompilerParams(
            dimension_semantics=("parallel", "arbitrary"),   # HW axis accumulates
            vmem_limit_bytes=vmem_limit,
        ),
    )(x, lab)

    # Tiny O(N*C) coefficient derivation in plain JAX between the two passes.
    g_fg, g_bg, c_fg, c_bg = _derive_coefs(
        stats[..., 0], stats[..., 1], stats[..., 2], stats[..., 3], stats[..., 4], hw)
    zeros = jnp.zeros_like(c_fg)
    coef = jnp.stack([g_fg, g_bg, c_fg, c_bg, zeros, zeros, zeros, zeros],
                     axis=-1).astype(jnp.float32)            # (N, C, 8)

    # Pass 2: fused elementwise normalization over (C, HW) tiles.
    return pl.pallas_call(
        _apply_kernel,
        out_shape=jax.ShapeDtypeStruct((n, c, hw), out_dtype),
        grid_spec=pltpu.PrefetchScalarGridSpec(
            num_scalar_prefetch=0,
            grid=grid,
            in_specs=[data_spec, data_spec, stat_spec],
            out_specs=data_spec,
        ),
        compiler_params=pltpu.CompilerParams(
            dimension_semantics=("parallel", "arbitrary"),
            vmem_limit_bytes=vmem_limit,
        ),
    )(x, lab, coef)


def rn_binarylabel(x_nchw, label_nchw, *, force_two_pass=False):
    """x, label: (N, C, H, W); label must be binary.  Output dtype matches x."""
    n, c, h, w = x_nchw.shape
    hw = h * w

    # NCHW -> (N, C, HW): a free reshape.  No casts / pads / slices in the
    # wrapper (no extra HBM passes); native dtypes flow straight into the kernel.
    x = x_nchw.reshape(n, c, hw)
    lab = label_nchw.reshape(n, c, hw)
    out_dtype = x.dtype

    itemsizes = (jnp.dtype(x.dtype).itemsize,
                 jnp.dtype(lab.dtype).itemsize,
                 jnp.dtype(out_dtype).itemsize)
    vmem_limit, block_budget = _vmem_budgets()

    c_block = None if force_two_pass else _pick_c_block(
        n, c, hw, itemsizes, block_budget, vmem_limit)

    if c_block is not None:
        out = _run_fused(x, lab, out_dtype, c_block, hw, itemsizes, vmem_limit)
    else:
        out = _run_two_pass(x, lab, out_dtype, hw, itemsizes, vmem_limit, block_budget)
    return out.reshape(n, c, h, w)


# --------------------------------------------------------------------------- #
# Pure-JAX reference (mirrors the PyTorch module)                              #
# --------------------------------------------------------------------------- #
def _reference(x, label):
    n, c, h, w = x.shape
    total = n * h * w

    def rn(region, mask):
        s = jnp.sum(region, axis=(0, 2, 3))
        sr = jnp.sum(mask, axis=(0, 2, 3))
        sr = jnp.where(sr == 0.0, 1.0, sr)
        mu = s / sr
        filled = region + (1.0 - mask) * mu[None, :, None, None]
        m = jnp.mean(filled, axis=(2, 3), keepdims=True)
        v = jnp.mean(jnp.square(filled - m), axis=(2, 3), keepdims=True)
        normed = (filled - m) / jnp.sqrt(v + EPS)
        return normed * jnp.sqrt(sr / total)[None, :, None, None]

    return rn(x * label, label) + rn(x * (1.0 - label), 1.0 - label)


if __name__ == "__main__":
    key = jax.random.PRNGKey(0)
    kx, kl = jax.random.split(key)

    # primary small-shape check
    N, C, H, W = 2, 4, 16, 16
    x = jax.random.normal(kx, (N, C, H, W), dtype=jnp.float32)
    label = jax.random.bernoulli(kl, p=0.5, shape=(N, C, H, W)).astype(jnp.float32)

    out = jax.block_until_ready(rn_binarylabel(x, label))
    ref = _reference(x, label)
    assert out.shape == (N, C, H, W)
    assert jnp.allclose(out, ref, atol=1e-4, rtol=1e-4), "fused kernel mismatch"

    # extra checks: multi-step channel grid + HW not a multiple of 128,
    # and the two-pass fallback path (forced at a small shape).
    k2x, k2l = jax.random.split(jax.random.PRNGKey(0))
    N2, C2, H2, W2 = 2, 16, 10, 10
    x2 = jax.random.normal(k2x, (N2, C2, H2, W2), dtype=jnp.float32)
    l2 = jax.random.bernoulli(k2l, p=0.3, shape=(N2, C2, H2, W2)).astype(jnp.float32)
    ref2 = _reference(x2, l2)
    out2 = jax.block_until_ready(rn_binarylabel(x2, l2))
    assert jnp.allclose(out2, ref2, atol=1e-4, rtol=1e-4), "multi-block mismatch"
    out3 = jax.block_until_ready(rn_binarylabel(x2, l2, force_two_pass=True))
    assert jnp.allclose(out3, ref2, atol=1e-4, rtol=1e-4), "two-pass mismatch"

    print("KERNEL_OK")
</pallas_src>

<mosaic_0001>
module attributes {stable_mosaic.version = 11 : i64} {
  func.func @_fused_kernel(%arg0: i32, %arg1: memref<2x4x256xf32, #tpu.memory_space<vmem>>, %arg2: memref<2x4x256xf32, #tpu.memory_space<vmem>>, %arg3: memref<2x4x256xf32, #tpu.memory_space<vmem>>) attributes {dimension_semantics = [#tpu.dimension_semantics<parallel>], iteration_bounds = array<i64: 1>, scalar_prefetch = 0 : i64, scratch_operands = 0 : i64, tpu.core_type = #tpu.core_type<tc>, window_params = [{transform_indices = @transform_0, window_bounds = array<i64: 2, 4, 256>}, {transform_indices = @transform_1, window_bounds = array<i64: 2, 4, 256>}, {transform_indices = @transform_2, window_bounds = array<i64: 2, 4, 256>}]} {
    %c0 = arith.constant 0 : index
    %c0_0 = arith.constant 0 : index
    %c0_1 = arith.constant 0 : index
    %0 = vector.load %arg1[%c0, %c0_0, %c0_1] : memref<2x4x256xf32, #tpu.memory_space<vmem>>, vector<2x4x256xf32>
    %c0_2 = arith.constant 0 : index
    %c0_3 = arith.constant 0 : index
    %c0_4 = arith.constant 0 : index
    %1 = vector.load %arg2[%c0_2, %c0_3, %c0_4] : memref<2x4x256xf32, #tpu.memory_space<vmem>>, vector<2x4x256xf32>
    %cst = arith.constant 0.000000e+00 : f32
    %2 = vector.broadcast %cst : f32 to vector<2x4x256xf32>
    %3 = arith.cmpf one, %1, %2 : vector<2x4x256xf32>
    %4 = arith.extui %3 : vector<2x4x256xi1> to vector<2x4x256xi32>
    %5 = arith.sitofp %4 : vector<2x4x256xi32> to vector<2x4x256xf32>
    %6 = arith.mulf %0, %5 : vector<2x4x256xf32>
    %cst_5 = arith.constant dense<0.000000e+00> : vector<2x4xf32>
    %7 = vector.multi_reduction <add>, %5, %cst_5 [2] : vector<2x4x256xf32> to vector<2x4xf32>
    %8 = vector.shape_cast %7 : vector<2x4xf32> to vector<2x4x1xf32>
    %cst_6 = arith.constant dense<0.000000e+00> : vector<2x4xf32>
    %9 = vector.multi_reduction <add>, %6, %cst_6 [2] : vector<2x4x256xf32> to vector<2x4xf32>
    %10 = vector.shape_cast %9 : vector<2x4xf32> to vector<2x4x1xf32>
    %cst_7 = arith.constant dense<0.000000e+00> : vector<2x4xf32>
    %11 = vector.multi_reduction <add>, %0, %cst_7 [2] : vector<2x4x256xf32> to vector<2x4xf32>
    %12 = vector.shape_cast %11 : vector<2x4xf32> to vector<2x4x1xf32>
    %13 = arith.mulf %6, %0 : vector<2x4x256xf32>
    %cst_8 = arith.constant dense<0.000000e+00> : vector<2x4xf32>
    %14 = vector.multi_reduction <add>, %13, %cst_8 [2] : vector<2x4x256xf32> to vector<2x4xf32>
    %15 = vector.shape_cast %14 : vector<2x4xf32> to vector<2x4x1xf32>
    %16 = arith.mulf %0, %0 : vector<2x4x256xf32>
    %cst_9 = arith.constant dense<0.000000e+00> : vector<2x4xf32>
    %17 = vector.multi_reduction <add>, %16, %cst_9 [2] : vector<2x4x256xf32> to vector<2x4xf32>
    %18 = vector.shape_cast %17 : vector<2x4xf32> to vector<2x4x1xf32>
    %cst_10 = arith.constant 2.000000e+00 : f32
    %cst_11 = arith.constant 2.560000e+02 : f32
    %19 = arith.mulf %cst_10, %cst_11 : f32
    %cst_12 = arith.constant dense<0.000000e+00> : vector<4x1xf32>
    %20 = vector.multi_reduction <add>, %8, %cst_12 [0] : vector<2x4x1xf32> to vector<4x1xf32>
    %21 = vector.shape_cast %20 : vector<4x1xf32> to vector<1x4x1xf32>
    %22 = vector.broadcast %19 : f32 to vector<1x4x1xf32>
    %23 = arith.subf %22, %21 : vector<1x4x1xf32>
    %cst_13 = arith.constant 0.000000e+00 : f32
    %24 = vector.broadcast %cst_13 : f32 to vector<1x4x1xf32>
    %25 = arith.cmpf oeq, %21, %24 : vector<1x4x1xf32>
    %cst_14 = arith.constant 1.000000e+00 : f32
    %26 = vector.broadcast %cst_14 : f32 to vector<1x4x1xf32>
    %27 = arith.select %25, %26, %21 : vector<1x4x1xi1>, vector<1x4x1xf32>
    %cst_15 = arith.constant 0.000000e+00 : f32
    %28 = vector.broadcast %cst_15 : f32 to vector<1x4x1xf32>
    %29 = arith.cmpf oeq, %23, %28 : vector<1x4x1xf32>
    %cst_16 = arith.constant 1.000000e+00 : f32
    %30 = vector.broadcast %cst_16 : f32 to vector<1x4x1xf32>
    %31 = arith.select %29, %30, %23 : vector<1x4x1xi1>, vector<1x4x1xf32>
    %cst_17 = arith.constant dense<0.000000e+00> : vector<4x1xf32>
    %32 = vector.multi_reduction <add>, %12, %cst_17 [0] : vector<2x4x1xf32> to vector<4x1xf32>
    %33 = vector.shape_cast %32 : vector<4x1xf32> to vector<1x4x1xf32>
    %cst_18 = arith.constant dense<0.000000e+00> : vector<4x1xf32>
    %34 = vector.multi_reduction <add>, %10, %cst_18 [0] : vector<2x4x1xf32> to vector<4x1xf32>
    %35 = vector.shape_cast %34 : vector<4x1xf32> to vector<1x4x1xf32>
    %36 = arith.divf %35, %27 : vector<1x4x1xf32>
    %37 = arith.subf %33, %35 : vector<1x4x1xf32>
    %38 = arith.divf %37, %31 : vector<1x4x1xf32>
    %39 = vector.broadcast %36 : vector<1x4x1xf32> to vector<2x4x1xf32>
    %40 = arith.mulf %8, %39 : vector<2x4x1xf32>
    %41 = arith.subf %10, %40 : vector<2x4x1xf32>
    %cst_19 = arith.constant 2.560000e+02 : f32
    %42 = vector.broadcast %cst_19 : f32 to vector<2x4x1xf32>
    %43 = arith.divf %41, %42 : vector<2x4x1xf32>
    %44 = vector.broadcast %36 : vector<1x4x1xf32> to vector<2x4x1xf32>
    %45 = arith.addf %44, %43 : vector<2x4x1xf32>
    %cst_20 = arith.constant 2.000000e+00 : f32
    %46 = vector.broadcast %cst_20 : f32 to vector<1x4x1xf32>
    %47 = arith.mulf %46, %36 : vector<1x4x1xf32>
    %48 = vector.broadcast %47 : vector<1x4x1xf32> to vector<2x4x1xf32>
    %49 = arith.mulf %48, %10 : vector<2x4x1xf32>
    %50 = arith.subf %15, %49 : vector<2x4x1xf32>
    %51 = arith.mulf %36, %36 : vector<1x4x1xf32>
    %52 = vector.broadcast %51 : vector<1x4x1xf32> to vector<2x4x1xf32>
    %53 = arith.mulf %52, %8 : vector<2x4x1xf32>
    %54 = arith.addf %50, %53 : vector<2x4x1xf32>
    %cst_21 = arith.constant 2.560000e+02 : f32
    %55 = vector.broadcast %cst_21 : f32 to vector<2x4x1xf32>
    %56 = arith.divf %54, %55 : vector<2x4x1xf32>
    %57 = arith.mulf %43, %43 : vector<2x4x1xf32>
    %58 = arith.subf %56, %57 : vector<2x4x1xf32>
    %cst_22 = arith.constant 0.000000e+00 : f32
    %59 = vector.broadcast %cst_22 : f32 to vector<2x4x1xf32>
    %60 = arith.maximumf %58, %59 : vector<2x4x1xf32>
    %cst_23 = arith.constant 9.99999974E-6 : f32
    %61 = vector.broadcast %cst_23 : f32 to vector<2x4x1xf32>
    %62 = arith.addf %60, %61 : vector<2x4x1xf32>
    %63 = math.rsqrt %62 : vector<2x4x1xf32>
    %64 = vector.broadcast %19 : f32 to vector<1x4x1xf32>
    %65 = arith.divf %27, %64 : vector<1x4x1xf32>
    %66 = math.sqrt %65 : vector<1x4x1xf32>
    %67 = vector.broadcast %66 : vector<1x4x1xf32> to vector<2x4x1xf32>
    %68 = arith.mulf %63, %67 : vector<2x4x1xf32>
    %cst_24 = arith.constant 2.560000e+02 : f32
    %69 = vector.broadcast %cst_24 : f32 to vector<2x4x1xf32>
    %70 = arith.subf %69, %8 : vector<2x4x1xf32>
    %71 = arith.subf %12, %10 : vector<2x4x1xf32>
    %72 = arith.subf %18, %15 : vector<2x4x1xf32>
    %73 = vector.broadcast %38 : vector<1x4x1xf32> to vector<2x4x1xf32>
    %74 = arith.mulf %70, %73 : vector<2x4x1xf32>
    %75 = arith.subf %71, %74 : vector<2x4x1xf32>
    %cst_25 = arith.constant 2.560000e+02 : f32
    %76 = vector.broadcast %cst_25 : f32 to vector<2x4x1xf32>
    %77 = arith.divf %75, %76 : vector<2x4x1xf32>
    %78 = vector.broadcast %38 : vector<1x4x1xf32> to vector<2x4x1xf32>
    %79 = arith.addf %78, %77 : vector<2x4x1xf32>
    %cst_26 = arith.constant 2.000000e+00 : f32
    %80 = vector.broadcast %cst_26 : f32 to vector<1x4x1xf32>
    %81 = arith.mulf %80, %38 : vector<1x4x1xf32>
    %82 = vector.broadcast %81 : vector<1x4x1xf32> to vector<2x4x1xf32>
    %83 = arith.mulf %82, %71 : vector<2x4x1xf32>
    %84 = arith.subf %72, %83 : vector<2x4x1xf32>
    %85 = arith.mulf %38, %38 : vector<1x4x1xf32>
    %86 = vector.broadcast %85 : vector<1x4x1xf32> to vector<2x4x1xf32>
    %87 = arith.mulf %86, %70 : vector<2x4x1xf32>
    %88 = arith.addf %84, %87 : vector<2x4x1xf32>
    %cst_27 = arith.constant 2.560000e+02 : f32
    %89 = vector.broadcast %cst_27 : f32 to vector<2x4x1xf32>
    %90 = arith.divf %88, %89 : vector<2x4x1xf32>
    %91 = arith.mulf %77, %77 : vector<2x4x1xf32>
    %92 = arith.subf %90, %91 : vector<2x4x1xf32>
    %cst_28 = arith.constant 0.000000e+00 : f32
    %93 = vector.broadcast %cst_28 : f32 to vector<2x4x1xf32>
    %94 = arith.maximumf %92, %93 : vector<2x4x1xf32>
    %cst_29 = arith.constant 9.99999974E-6 : f32
    %95 = vector.broadcast %cst_29 : f32 to vector<2x4x1xf32>
    %96 = arith.addf %94, %95 : vector<2x4x1xf32>
    %97 = math.rsqrt %96 : vector<2x4x1xf32>
    %98 = vector.broadcast %19 : f32 to vector<1x4x1xf32>
    %99 = arith.divf %31, %98 : vector<1x4x1xf32>
    %100 = math.sqrt %99 : vector<1x4x1xf32>
    %101 = vector.broadcast %100 : vector<1x4x1xf32> to vector<2x4x1xf32>
    %102 = arith.mulf %97, %101 : vector<2x4x1xf32>
    %103 = vector.broadcast %38 : vector<1x4x1xf32> to vector<2x4x1xf32>
    %104 = arith.subf %103, %79 : vector<2x4x1xf32>
    %105 = arith.mulf %104, %102 : vector<2x4x1xf32>
    %106 = arith.mulf %45, %68 : vector<2x4x1xf32>
    %107 = arith.subf %105, %106 : vector<2x4x1xf32>
    %108 = vector.broadcast %36 : vector<1x4x1xf32> to vector<2x4x1xf32>
    %109 = arith.subf %108, %45 : vector<2x4x1xf32>
    %110 = arith.mulf %109, %68 : vector<2x4x1xf32>
    %111 = arith.mulf %79, %102 : vector<2x4x1xf32>
    %112 = arith.subf %110, %111 : vector<2x4x1xf32>
    %113 = vector.shape_cast %68 : vector<2x4x1xf32> to vector<2x4x1xf32>
    %114 = vector.broadcast %113 : vector<2x4x1xf32> to vector<2x4x256xf32>
    %115 = vector.shape_cast %102 : vector<2x4x1xf32> to vector<2x4x1xf32>
    %116 = vector.broadcast %115 : vector<2x4x1xf32> to vector<2x4x256xf32>
    %117 = arith.select %3, %114, %116 : vector<2x4x256xi1>, vector<2x4x256xf32>
    %118 = arith.mulf %0, %117 : vector<2x4x256xf32>
    %119 = vector.shape_cast %107 : vector<2x4x1xf32> to vector<2x4x1xf32>
    %120 = vector.broadcast %119 : vector<2x4x1xf32> to vector<2x4x256xf32>
    %121 = vector.shape_cast %112 : vector<2x4x1xf32> to vector<2x4x1xf32>
    %122 = vector.broadcast %121 : vector<2x4x1xf32> to vector<2x4x256xf32>
    %123 = arith.select %3, %120, %122 : vector<2x4x256xi1>, vector<2x4x256xf32>
    %124 = arith.addf %118, %123 : vector<2x4x256xf32>
    %c0_30 = arith.constant 0 : index
    %c0_31 = arith.constant 0 : index
    %c0_32 = arith.constant 0 : index
    %125 = vector.load %arg3[%c0_30, %c0_31, %c0_32] : memref<2x4x256xf32, #tpu.memory_space<vmem>>, vector<2x4x256xf32>
    tpu.vector_store %arg3[%c0_30, %c0_31, %c0_32], %124 {strides = array<i32>} : memref<2x4x256xf32, #tpu.memory_space<vmem>>, vector<2x4x256xf32>,
    return
  }
  func.func @transform_0(%arg0: i32) -> (i32, i32, i32) {
    %c0_i32 = arith.constant 0 : i32
    %c0_i32_0 = arith.constant 0 : i32
    %c0_i32_1 = arith.constant 0 : i32
    return %c0_i32, %arg0, %c0_i32_0 : i32, i32, i32
  }
  func.func @transform_1(%arg0: i32) -> (i32, i32, i32) {
    %c0_i32 = arith.constant 0 : i32
    %c0_i32_0 = arith.constant 0 : i32
    %c0_i32_1 = arith.constant 0 : i32
    return %c0_i32, %arg0, %c0_i32_0 : i32, i32, i32
  }
  func.func @transform_2(%arg0: i32) -> (i32, i32, i32) {
    %c0_i32 = arith.constant 0 : i32
    %c0_i32_0 = arith.constant 0 : i32
    %c0_i32_1 = arith.constant 0 : i32
    return %c0_i32, %arg0, %c0_i32_0 : i32, i32, i32
  }
}

</mosaic_0001>

<bundles_post_ra>
// kernel: tpu_custom_call.1
= control target key start
LH: loop header
LB: loop body
LE: loop exit
PB: predicated region body
PF: predicated region fallthrough
CT: control target
= control target key end

     0   :  { %7 = vsyncpa [#allocation3], 0  ;;  %s617_s0 = inlined_call_operand.hbm [shape: f32[2,4,256], index: 0, kind: input, shape index: {}]   ;;  %s618_s1 = inlined_call_operand.hbm [shape: f32[2,4,256], index: 1, kind: input, shape index: {}]   ;;  %s619_s2 = inlined_call_operand.hbm [shape: f32[2,4,256], index: 2, kind: output, shape index: {}]  }
   0x1   :  { %8 = vsyncpa [#allocation6], 0 }
   0x2   :  { %9 = vsyncpa [#allocation4], 0  ;;  %s453_s9 = smov [#allocation2]  }
   0x3   :  { %s15_s10 = sshll.u32 %s453_s9, 4  ;;  %s16_s10 = int_to_ptr.vmem [resolvable:$true] %s15_s10 }
   0x4   :  { %s395_s11 = scalar_lea.vmem %s16_s10, 256  ;;  %p400_p1 = scmp.lt.s32.totalorder %s16_s10, %s16_s10 }
   0x5   :  { %p396_p0 = scmp.ne.s32.totalorder %s16_s10, %s395_s11  ;;  %p401_p2 = scmp.lt.s32.totalorder %s395_s11, %s395_s11 }
   0x7   :  { %p402_p3 = por %p401_p2, %p400_p1 }
   0x9   :  { %p403_p4 = pnand %p402_p3, %p396_p0 }
   0xb   :  { %406 = shalt.err (!%p403_p4)
}
   0xc   :  { %s454_s12 = smov 128   ;;  %s455_s13 = smov 8  }
   0xd   :  { %21 = dma.hbm_to_vmem [thread:$0]  %s617_s0, 256, %s16_s10, [#allocation3], %s454_s12, %s454_s12, %s455_s13  }
   0xe   :  { %s456_s16 = smov [#allocation5]  }
   0xf   :  { %s27_s17 = sshll.u32 %s456_s16, 4  ;;  %s28_s17 = int_to_ptr.vmem [resolvable:$true] %s27_s17 }
  0x10   :  { %s415_s18 = scalar_lea.vmem %s28_s17, 256  ;;  %p420_p6 = scmp.lt.s32.totalorder %s28_s17, %s28_s17 }
  0x11   :  { %p416_p5 = scmp.ne.s32.totalorder %s28_s17, %s415_s18  ;;  %p421_p7 = scmp.lt.s32.totalorder %s415_s18, %s415_s18 }
  0x13   :  { %p422_p8 = por %p421_p7, %p420_p6 }
  0x15   :  { %p423_p9 = pnand %p422_p8, %p416_p5 }
  0x17   :  { %426 = shalt.err (!%p423_p9)
}
  0x18   :  { %33 = dma.hbm_to_vmem [thread:$0]  %s618_s1, 256, %s28_s17, [#allocation6], %s454_s12, %s454_s12, %s455_s13  }
  0x19   :  { %447 = dma.done.wait [#allocation3], 256  }
  0x1a   :  { %448 = vsyncadd [#allocation3], 4294967040 }
  0x1b   :  { %449 = dma.done.wait [#allocation6], 256  }
  0x1c   :  { %450 = vsyncadd [#allocation6], 4294967040  ;;  %v487_v0 = vld [vmem:[#allocation5] sm:$0xff]  ;;  %vm58_vm0 = vcmask 1043456   ;;  %v489_v1 = vld [vmem:[#allocation5 + $0x8] sm:$0xff]  ;;  %v457_v4 = vmov 0.0  }
  0x1d   :  { %vm44_vm1 = vcmp.ne.f32.partialorder %v487_v0, 0.0  ;;  %vm45_vm2 = vcmp.ne.f32.partialorder %v489_v1, 0.0  ;;  %v493_v2 = vld [vmem:[#allocation2] sm:$0xff]  ;;  %v495_v3 = vld [vmem:[#allocation2 + $0x8] sm:$0xff]  ;;  %s459_s0 = smov [#allocation7]  }
  0x1e   :  { %v360_v5 = vsel %vm44_vm1, 1.0, %v457_v4  ;;  %v361_v6 = vsel %vm45_vm2, 1.0, %v457_v4  ;;  %v87_v10 = vcombine.high %v493_v2, %v493_v2  ;;  %v91_v19 = vsel %vm58_vm0, %v493_v2, 0.0  ;;  %s347_s1 = sshll.u32 %s459_s0, 4  ;;  %s348_s1 = int_to_ptr.vmem [resolvable:$true] %s347_s1 }
  0x1f   :  { %v54_v7 = vcombine.high %v360_v5, %v360_v5  ;;  %v59_v8 = vsel %vm58_vm0, %v360_v5, 0.0  ;;  %v55_v9 = vcombine.high %v361_v6, %v361_v6  ;;  %v50_v11 = vmul.f32 %v360_v5, %v493_v2  ;;  %s427_s21 = scalar_lea.vmem %s348_s1, 256  ;;  %p432_p11 = scmp.lt.s32.totalorder %s348_s1, %s348_s1 }
  0x20   :  { %v51_v12 = vmul.f32 %v361_v6, %v495_v3  ;;  %v64_v14 = vsel %vm58_vm0, %v361_v6, 0.0  ;;  %v92_v21 = vsel %vm58_vm0, %v87_v10, 0.0  ;;  %v88_v22 = vcombine.high %v495_v3, %v495_v3  ;;  %p428_p10 = scmp.ne.s32.totalorder %s348_s1, %s427_s21  ;;  %p433_p12 = scmp.lt.s32.totalorder %s427_s21, %s427_s21 }
  0x21   :  { %v60_v13 = vsel %vm58_vm0, %v54_v7, 0.0  ;;  %v65_v15 = vsel %vm58_vm0, %v55_v9, 0.0  ;;  %v71_v17 = vcombine.high %v50_v11, %v50_v11  ;;  %v75_v18 = vsel %vm58_vm0, %v50_v11, 0.0 }
  0x22   :  { %v61_v16 = vadd.f32 %v60_v13, %v59_v8  ;;  %v72_v20 = vcombine.high %v51_v12, %v51_v12  ;;  %v101_v23 = vmul.f32 %v50_v11, %v493_v2  ;;  %v66_v24 = vadd.f32 %v65_v15, %v64_v14  ;;  %p434_p13 = por %p433_p12, %p432_p11 }
  0x23   :  { %v76_v25 = vsel %vm58_vm0, %v71_v17, 0.0  ;;  %v80_v26 = vsel %vm58_vm0, %v51_v12, 0.0  ;;  %v102_v27 = vmul.f32 %v51_v12, %v495_v3  ;;  %v119_v31 = vmul.f32 %v493_v2, %v493_v2 }
  0x24   :  { %62 = vadd.xlane.f32.xlu0 %v61_v16  ;;  %v77_v28 = vadd.f32 %v76_v25, %v75_v18  ;;  %v81_v29 = vsel %vm58_vm0, %v72_v20, 0.0  ;;  %v105_v30 = vcombine.high %v101_v23, %v101_v23  ;;  %v96_v33 = vsel %vm58_vm0, %v495_v3, 0.0  ;;  %p435_p0 = pnand %p434_p13, %p428_p10 }
  0x25   :  { %v82_v32 = vadd.f32 %v81_v29, %v80_v26  ;;  %v93_v34 = vadd.f32 %v92_v21, %v91_v19  ;;  %v97_v35 = vsel %vm58_vm0, %v88_v22, 0.0  ;;  %v106_v36 = vcombine.high %v102_v27, %v102_v27 }
  0x26   :  { %78 = vadd.xlane.f32.xlu1 %v77_v28  ;;  %v120_v37 = vmul.f32 %v495_v3, %v495_v3  ;;  %v109_v38 = vsel %vm58_vm0, %v101_v23, 0.0  ;;  %v110_v39 = vsel %vm58_vm0, %v105_v30, 0.0  ;;  %v123_v40 = vcombine.high %v119_v31, %v119_v31 }
  0x27   :  { %v98_v41 = vadd.f32 %v97_v35, %v96_v33  ;;  %v111_v42 = vadd.f32 %v110_v39, %v109_v38  ;;  %v114_v43 = vsel %vm58_vm0, %v102_v27, 0.0  ;;  %v115_v44 = vsel %vm58_vm0, %v106_v36, 0.0 }
  0x28   :  { %67 = vadd.xlane.f32.xlu0 %v66_v24  ;;  %v124_v45 = vcombine.high %v120_v37, %v120_v37  ;;  %v127_v46 = vsel %vm58_vm0, %v119_v31, 0.0  ;;  %v128_v47 = vsel %vm58_vm0, %v123_v40, 0.0  ;;  %v116_v48 = vadd.f32 %v115_v44, %v114_v43 }
  0x29   :  { %v129_v49 = vadd.f32 %v128_v47, %v127_v46  ;;  %v132_v50 = vsel %vm58_vm0, %v120_v37, 0.0 }
  0x2a   :  { %83 = vadd.xlane.f32.xlu1 %v82_v32  ;;  %v133_v51 = vsel %vm58_vm0, %v124_v45, 0.0 }
  0x2b   :  { %v134_v52 = vadd.f32 %v133_v51, %v132_v50 }
  0x2c   :  { %94 = vadd.xlane.f32.xlu0 %v93_v34 }
  0x2e   :  { %99 = vadd.xlane.f32.xlu1 %v98_v41 }
  0x30   :  { %112 = vadd.xlane.f32.xlu0 %v111_v42 }
  0x32   :  { %117 = vadd.xlane.f32.xlu1 %v116_v48 }
  0x34   :  { %130 = vadd.xlane.f32.xlu0 %v129_v49 }
  0x36   :  { %135 = vadd.xlane.f32.xlu1 %v134_v52 }
  0xad   :  { %v535_v53 = vpop.xlane.xlu0 %62 }
  0xae   :  { %v137_v56 = vsel %vm58_vm0, %v535_v53, 0.0  ;;  %v198_v26 = vsub.f32 256.0, %v535_v53 }
  0xaf   :  { %v79_v54 = vpop.xlane.xlu1 %78 }
  0xb0   :  { %v148_v5 = vsel %vm58_vm0, %v79_v54, 0.0 }
  0xb1   :  { %v537_v55 = vpop.xlane.xlu0 %67 }
  0xb2   :  { %v138_v57 = vsel %vm58_vm0, %v537_v55, 0.0  ;;  %v199_v22 = vsub.f32 256.0, %v537_v55 }
  0xb3   :  { %v139_v58 = vadd.f32 %v138_v57, %v137_v56  ;;  %v84_v60 = vpop.xlane.xlu1 %83 }
  0xb4   :  { %v149_v6 = vsel %vm58_vm0, %v84_v60, 0.0 }
  0xb5   :  { %v140_v59 = vsub.f32 512.0, %v139_v58  ;;  %vm141_vm3 = vcmp.eq.f32.partialorder %v139_v58, 0.0  ;;  %v95_v63 = vpop.xlane.xlu0 %94  ;;  %v150_v9 = vadd.f32 %v149_v6, %v148_v5 }
  0xb6   :  { %v142_v61 = vsel %vm141_vm3, 1.0, %v139_v58  ;;  %v145_v7 = vsel %vm58_vm0, %v95_v63, 0.0  ;;  %v200_v40 = vsub.f32 %v95_v63, %v79_v54 }
  0xb7   :  { %vm143_vm4 = vcmp.eq.f32.partialorder %v140_v59, 0.0  ;;  %371 = vrcp.f32 %v142_v61  ;;  %v100_v4 = vpop.xlane.xlu1 %99  ;;  %v568_v39 = vmul.f32 0.001953125, %v142_v61 }
  0xb8   :  { %v144_v62 = vsel %vm143_vm4, 1.0, %v140_v59  ;;  %v146_v8 = vsel %vm58_vm0, %v100_v4, 0.0  ;;  %v201_v30 = vsub.f32 %v100_v4, %v84_v60 }
  0xb9   :  { %373 = vrcp.f32 %v144_v62  ;;  %v147_v10 = vadd.f32 %v146_v8, %v145_v7  ;;  %v113_v14 = vpop.xlane.xlu0 %112  ;;  %vm191_vm5 = vcmp.eq.f32.partialorder %v568_v39, inf  ;;  %vm193_vm6 = vcmp.eq.f32.partialorder %v568_v39, 0.0 }
  0xba   :  { %375 = vrsqrt.f32 %v568_v39 }
  0xbb   :  { %v153_v13 = vsub.f32 %v147_v10, %v150_v9  ;;  %v118_v16 = vpop.xlane.xlu1 %117 }
  0xbd   :  { %v131_v33 = vpop.xlane.xlu0 %130 }
  0xbe   :  { %v202_v45 = vsub.f32 %v131_v33, %v113_v14 }
  0xbf   :  { %v136_v38 = vpop.xlane.xlu1 %135 }
  0xc0   :  { %v203_v49 = vsub.f32 %v136_v38, %v118_v16 }
  0xc4   :  { %v372_v11 = vpop.eup %371 }
  0xc5   :  { %v547_v12 = vmul.f32 %v372_v11, %v150_v9 }
  0xc6   :  { %v374_v15 = vpop.eup %373 }
  0xc7   :  { %v157_v17 = vmul.f32 %v547_v12, %v537_v55  ;;  %v551_v18 = vmul.f32 %v374_v15, %v153_v13  ;;  %v156_v19 = vmul.f32 %v547_v12, %v535_v53  ;;  %v165_v20 = vmul.f32 2.0, %v547_v12 }
  0xc8   :  { %v170_v21 = vmul.f32 %v547_v12, %v547_v12 }
  0xc9   :  { %v159_v23 = vsub.f32 %v84_v60, %v157_v17  ;;  %v212_v24 = vmul.f32 2.0, %v551_v18  ;;  %v158_v25 = vsub.f32 %v79_v54, %v156_v19  ;;  %v166_v27 = vmul.f32 %v165_v20, %v79_v54 }
  0xca   :  { %v167_v28 = vmul.f32 %v165_v20, %v84_v60  ;;  %v205_v31 = vmul.f32 %v199_v22, %v551_v18  ;;  %v171_v32 = vmul.f32 %v170_v21, %v535_v53  ;;  %v172_v36 = vmul.f32 %v170_v21, %v537_v55 }
  0xcb   :  { %v561_v29 = vmul.f32 0.00390625, %v159_v23  ;;  %v565_v34 = vmul.f32 0.00390625, %v158_v25  ;;  %v168_v35 = vsub.f32 %v113_v14, %v166_v27  ;;  %v214_v41 = vmul.f32 %v212_v24, %v201_v30 }
  0xcc   :  { %v169_v37 = vsub.f32 %v118_v16, %v167_v28  ;;  %v204_v42 = vmul.f32 %v198_v26, %v551_v18  ;;  %v207_v46 = vsub.f32 %v201_v30, %v205_v31  ;;  %v213_v53 = vmul.f32 %v212_v24, %v200_v40 }
  0xcd   :  { %v173_v43 = vadd.f32 %v171_v32, %v168_v35  ;;  %v178_v47 = vmul.f32 %v561_v29, %v561_v29  ;;  %v177_v51 = vmul.f32 %v565_v34, %v565_v34  ;;  %v576_v54 = vmul.f32 0.001953125, %v144_v62 }
  0xce   :  { %v174_v44 = vadd.f32 %v172_v36, %v169_v37  ;;  %v206_v48 = vsub.f32 %v200_v40, %v204_v42  ;;  %v217_v55 = vmul.f32 %v551_v18, %v551_v18  ;;  %v216_v56 = vsub.f32 %v203_v49, %v214_v41 }
  0xcf   :  { %v175_v50 = vmul.f32 0.00390625, %v173_v43  ;;  %v215_v59 = vsub.f32 %v202_v45, %v213_v53  ;;  %v209_v60 = vmul.f32 0.00390625, %v207_v46  ;;  %377 = vrsqrt.f32 %v576_v54 }
  0xd0   :  { %v176_v52 = vmul.f32 0.00390625, %v174_v44  ;;  %v208_v61 = vmul.f32 0.00390625, %v206_v48  ;;  %v218_v63 = vmul.f32 %v217_v55, %v198_v26  ;;  %v219_v4 = vmul.f32 %v217_v55, %v199_v22  ;;  %v376_v22 = vpop.eup %375 }
  0xd1   :  { %v179_v57 = vsub.f32 %v175_v50, %v177_v51  ;;  %v225_v10 = vmul.f32 %v209_v60, %v209_v60  ;;  %v190_v23 = vmul.f32 %v376_v22, %v568_v39  ;;  %v458_v25 = vmov 839922192  }
  0xd2   :  { %v180_v58 = vsub.f32 %v176_v52, %v178_v47  ;;  %v220_v7 = vadd.f32 %v218_v63, %v215_v59  ;;  %v221_v8 = vadd.f32 %v219_v4, %v216_v56  ;;  %v224_v13 = vmul.f32 %v208_v61, %v208_v61 }
  0xd3   :  { %v181_v5 = vmax.f32 %v179_v57, 0.0  ;;  %v263_v26 = vunpack.c.l.s4 %v458_v25  ;;  %v265_v27 = vlaneseq  ;;  %v192_v28 = vsel %vm191_vm5, %v568_v39, %v190_v23 }
  0xd4   :  { %v182_v6 = vmax.f32 %v180_v58, 0.0  ;;  %v222_v11 = vmul.f32 0.00390625, %v220_v7  ;;  %v223_v14 = vmul.f32 0.00390625, %v221_v8  ;;  %v194_v32 = vand.u32 2147483648, %v568_v39 }
  0xd5   :  { %v183_v9 = vadd.f32 1e-05, %v181_v5  ;;  %v264_v33 = vunpack.c.0.s8 %v263_v26  ;;  %v266_v35 = vshrl.u32 %v265_v27, 7  ;;  %v164_v37 = vadd.f32 %v561_v29, %v547_v12 }
  0xd6   :  { %v184_v62 = vadd.f32 1e-05, %v182_v6  ;;  %v226_v15 = vsub.f32 %v222_v11, %v224_v13  ;;  %v227_v16 = vsub.f32 %v223_v14, %v225_v10  ;;  %v195_v38 = vsel %vm193_vm6, %v194_v32, %v192_v28 }
  0xd7   :  { %379 = vrsqrt.f32 %v183_v9  ;;  %v163_v40 = vadd.f32 %v565_v34, %v547_v12  ;;  %vm237_vm7 = vcmp.eq.f32.partialorder %v576_v54, inf  ;;  %v211_v41 = vadd.f32 %v209_v60, %v551_v18 }
  0xd8   :  { %381 = vrsqrt.f32 %v184_v62  ;;  %v228_v17 = vmax.f32 %v226_v15, 0.0  ;;  %v229_v19 = vmax.f32 %v227_v16, 0.0  ;;  %v210_v43 = vadd.f32 %v208_v61, %v551_v18 }
  0xd9   :  { %v240_v46 = vand.u32 2147483648, %v576_v54  ;;  %v267_v39 = vsub.s32 %v264_v33, %v266_v35  ;;  %vm239_vm8 = vcmp.eq.f32.partialorder %v576_v54, 0.0  ;;  %v253_v47 = vsub.f32 %v547_v12, %v164_v37 }
  0xda   :  { %v230_v20 = vadd.f32 1e-05, %v228_v17  ;;  %v231_v21 = vadd.f32 1e-05, %v229_v19  ;;  %v252_v34 = vsub.f32 %v547_v12, %v163_v40  ;;  %v245_v50 = vsub.f32 %v551_v18, %v211_v41 }
  0xdb   :  { %v244_v52 = vsub.f32 %v551_v18, %v210_v43 }
  0xdc   :  { %383 = vrsqrt.f32 %v230_v20  ;;  %v378_v24 = vpop.eup %377 }
  0xdd   :  { %385 = vrsqrt.f32 %v231_v21  ;;  %v236_v30 = vmul.f32 %v378_v24, %v576_v54 }
  0xdf   :  { %v238_v44 = vsel %vm237_vm7, %v576_v54, %v236_v30 }
  0xe0   :  { %v241_v48 = vsel %vm239_vm8, %v240_v46, %v238_v44 }
  0xe4   :  { %v380_v31 = vpop.eup %379 }
  0xe5   :  { %v382_v36 = vpop.eup %381  ;;  %v196_v42 = vmul.f32 %v380_v31, %v195_v38 }
  0xe6   :  { %v197_v45 = vmul.f32 %v382_v36, %v195_v38 }
  0xe7   :  { %v248_v51 = vmul.f32 %v196_v42, %v163_v40  ;;  %v254_v57 = vmul.f32 %v252_v34, %v196_v42  ;;  %v268_v58 = vrot.slane %v196_v42, %v267_v39 }
  0xe8   :  { %v249_v56 = vmul.f32 %v197_v45, %v164_v37  ;;  %v255_v60 = vmul.f32 %v253_v47, %v197_v45  ;;  %v275_v5 = vrot.slane %v197_v45, %v267_v39 }
  0xe9   :  { %v384_v29 = vpop.eup %383 }
  0xea   :  { %v386_v49 = vpop.eup %385  ;;  %v242_v53 = vmul.f32 %v384_v29, %v241_v48 }
  0xeb   :  { %v243_v55 = vmul.f32 %v386_v49, %v241_v48 }
  0xec   :  { %v246_v59 = vmul.f32 %v244_v52, %v242_v53  ;;  %v256_v54 = vmul.f32 %v242_v53, %v210_v43  ;;  %v286_v61 = vrot.slane %v242_v53, %v267_v39 }
  0xed   :  { %v247_v63 = vmul.f32 %v245_v50, %v243_v55  ;;  %v257_v4 = vmul.f32 %v243_v55, %v211_v41  ;;  %v293_v12 = vrot.slane %v243_v55, %v267_v39 }
  0xee   :  { %v250_v6 = vsub.f32 %v246_v59, %v248_v51  ;;  %v258_v7 = vsub.f32 %v254_v57, %v256_v54  ;;  %v296_v8 = vsel %vm44_vm1, %v268_v58, %v286_v61 }
  0xef   :  { %v251_v9 = vsub.f32 %v247_v63, %v249_v56  ;;  %v259_v18 = vsub.f32 %v255_v60, %v257_v4  ;;  %v297_v62 = vsel %vm45_vm2, %v275_v5, %v293_v12  ;;  %v298_v13 = vmul.f32 %v296_v8, %v493_v2 }
  0xf0   :  { %v308_v10 = vrot.slane %v250_v6, %v267_v39  ;;  %v326_v11 = vrot.slane %v258_v7, %v267_v39  ;;  %v299_v16 = vmul.f32 %v297_v62, %v495_v3 }
  0xf1   :  { %v315_v14 = vrot.slane %v251_v9, %v267_v39  ;;  %v333_v15 = vrot.slane %v259_v18, %v267_v39 }
  0xf2   :  { %v336_v17 = vsel %vm44_vm1, %v308_v10, %v326_v11 }
  0xf3   :  { %v337_v19 = vsel %vm45_vm2, %v315_v14, %v333_v15  ;;  %v338_v20 = vadd.f32 %v336_v17, %v298_v13 }
  0xf4   :  { %v339_v21 = vadd.f32 %v337_v19, %v299_v16 }
  0xf5   :  { %340 = vst [vmem:[#allocation7] sm:$0xff] %v338_v20 }
  0xf6   :  { %341 = vst [vmem:[#allocation7 + $0x8] sm:$0xff] %v339_v21 }
  0xf7   :  { %438 = shalt.err (!%p435_p0)
}
  0xf8   :  { %353 = dma.vmem_to_hbm [thread:$0]  %s348_s1, 256, %s619_s2, [#allocation4], %s454_s12, %s454_s12, %s455_s13  }
  0xf9   :  { %451 = dma.done.wait [#allocation4], 256  }
  0xfa   :  { %452 = vsyncadd [#allocation4], 4294967040 }
  0xfb   :  { %357 = vsyncpa [#allocation3], 1 }
  0xfc   :  { %358 = vsyncpa [#allocation6], 1 }
  0xfd   :  { %359 = vsyncpa [#allocation4], 1 }

</bundles_post_ra>
